<compile_context>
chip_gen: v7x
topology: tpu7x:2x2x1
jax: 0.10.0
libtpu: 0.0.40
codegen_flags: <defaults>
</compile_context>

<pallas_src>
import functools

import jax
import jax.numpy as jnp
from jax.experimental import pallas as pl
from jax.experimental.pallas import tpu as pltpu

GAMMA = 1.5
ALPHA = 0.25
LANE = 128
SUBLANE = 8
MAX_TILE_ROWS = 2048   # (2048,128) f32 = 1 MiB/input; fits default scoped VMEM everywhere
NUM_SHARDS = 2         # "parallel" leading axis: 2 TCs on v7x, no-op on v5e/v6e
PAD_LOGIT = -100.0     # padded elems: sigmoid~0, target 0 -> focal-BCE loss ~ 0


def _focal_loss_kernel(pred_ref, true_ref, out_ref, *, gamma, alpha):
    # out_ref is an (8,128) partial-sum block, resident across the inner
    # ("arbitrary") axis; one block per shard of the leading "parallel" axis.
    @pl.when(pl.program_id(1) == 0)
    def _():
        out_ref[...] = jnp.zeros_like(out_ref)

    x = pred_ref[...].astype(jnp.float32)
    y = true_ref[...].astype(jnp.float32)

    # One exp shared between the numerically stable BCE term and the sigmoid.
    e = jnp.exp(-jnp.abs(x))                                # EUP exp
    # BCEWithLogits(reduction='none'): max(x,0) - x*y + log1p(exp(-|x|))
    bce = jnp.maximum(x, 0.0) - x * y + jnp.log1p(e)        # EUP log
    inv = 1.0 / (1.0 + e)                                   # EUP recip
    pred_prob = jnp.where(x >= 0.0, inv, e * inv)           # sigmoid(x)

    p_t = y * pred_prob + (1.0 - y) * (1.0 - pred_prob)
    alpha_factor = y * alpha + (1.0 - y) * (1.0 - alpha)
    one_minus_pt = 1.0 - p_t
    if gamma == 1.5:
        modulating = one_minus_pt * jnp.sqrt(one_minus_pt)  # EUP sqrt (no log(0))
    elif gamma == 2.0:
        modulating = one_minus_pt * one_minus_pt
    elif gamma == 1.0:
        modulating = one_minus_pt
    elif gamma == 0.0:
        modulating = jnp.ones_like(one_minus_pt)
    else:
        modulating = one_minus_pt ** gamma

    loss = bce * alpha_factor * modulating                  # (tile_rows, 128)

    # Vector accumulation: fold row-groups of 8 into the (8,128) accumulator
    # (pure VPU adds); the scalar reduce happens once, in the wrapper.
    out_ref[...] += loss.reshape(-1, SUBLANE, LANE).sum(axis=0)


def focal_loss(pred, true, gamma=GAMMA, alpha=ALPHA, reduction="mean"):
    """Focal loss on top of BCE-with-logits. pred/true: same shape (e.g. NCHW)."""
    assert pred.shape == true.shape
    n_valid = pred.size

    flat_p = pred.reshape(-1)
    flat_t = true.reshape(-1)

    rows_needed = pl.cdiv(n_valid, LANE)
    tile_rows = min(
        MAX_TILE_ROWS,
        pl.cdiv(pl.cdiv(rows_needed, NUM_SHARDS), SUBLANE) * SUBLANE,
    )
    blocks_per_shard = pl.cdiv(rows_needed, tile_rows * NUM_SHARDS)
    padded_rows = NUM_SHARDS * blocks_per_shard * tile_rows
    pad = padded_rows * LANE - n_valid

    # Pad pred with a large-negative logit and true with 0 so padded elements
    # contribute ~0 loss -> no separate mask input / extra HBM traffic.
    flat_p = jnp.pad(flat_p, (0, pad),
                     constant_values=jnp.asarray(PAD_LOGIT, flat_p.dtype))
    flat_t = jnp.pad(flat_t, (0, pad),
                     constant_values=jnp.asarray(0, flat_t.dtype))

    p2 = flat_p.reshape(padded_rows, LANE)
    t2 = flat_t.reshape(padded_rows, LANE)

    in_spec = pl.BlockSpec(
        (tile_rows, LANE), lambda s, i: (s * blocks_per_shard + i, 0))
    out_spec = pl.BlockSpec((SUBLANE, LANE), lambda s, i: (s, 0))

    kernel = functools.partial(_focal_loss_kernel, gamma=gamma, alpha=alpha)

    partials = pl.pallas_call(
        kernel,
        out_shape=jax.ShapeDtypeStruct((NUM_SHARDS * SUBLANE, LANE), jnp.float32),
        grid_spec=pltpu.PrefetchScalarGridSpec(
            num_scalar_prefetch=0,
            grid=(NUM_SHARDS, blocks_per_shard),
            in_specs=[in_spec, in_spec],
            out_specs=out_spec,
        ),
        compiler_params=pltpu.CompilerParams(
            dimension_semantics=("parallel", "arbitrary"),
            vmem_limit_bytes=32 * 1024 * 1024,
        ),
    )(p2, t2)

    total = jnp.sum(partials)

    if reduction == "mean":
        return total / jnp.float32(n_valid)
    elif reduction == "sum":
        return total
    else:
        # TODO(synk): reduction='none' would need an elementwise-output kernel;
        # YOLO wraps BCEWithLogitsLoss(reduction='mean'), which is what we match.
        raise NotImplementedError("only 'mean' and 'sum' reductions implemented")


def _reference(pred, true, gamma=GAMMA, alpha=ALPHA):
    x = pred.astype(jnp.float32)
    y = true.astype(jnp.float32)
    bce = jnp.maximum(x, 0.0) - x * y + jnp.log1p(jnp.exp(-jnp.abs(x)))
    p = jax.nn.sigmoid(x)
    p_t = y * p + (1 - y) * (1 - p)
    af = y * alpha + (1 - y) * (1 - alpha)
    mf = (1.0 - p_t) ** gamma
    return jnp.mean(bce * af * mf)


if __name__ == "__main__":
    key = jax.random.PRNGKey(0)
    k1, k2 = jax.random.split(key)
    # Shapes consistent with a YOLO classification/objectness head: NCHW logits.
    pred = jax.random.normal(k1, (2, 4, 16, 16), dtype=jnp.float32)
    true = (jax.random.uniform(k2, (2, 4, 16, 16)) > 0.8).astype(jnp.float32)

    out = jax.block_until_ready(focal_loss(pred, true))

    ref = _reference(pred, true)
    assert jnp.allclose(out, ref, rtol=1e-4, atol=1e-6), (out, ref)
    print("KERNEL_OK")
</pallas_src>

<mosaic_0001>
module attributes {stable_mosaic.version = 11 : i64} {
  func.func @_focal_loss_kernel(%arg0: i32, %arg1: i32, %arg2: memref<8x128xf32, #tpu.memory_space<vmem>>, %arg3: memref<8x128xf32, #tpu.memory_space<vmem>>, %arg4: memref<8x128xf32, #tpu.memory_space<vmem>>) attributes {dimension_semantics = [#tpu.dimension_semantics<parallel>, #tpu.dimension_semantics<arbitrary>], iteration_bounds = array<i64: 2, 1>, scalar_prefetch = 0 : i64, scratch_operands = 0 : i64, tpu.core_type = #tpu.core_type<tc>, window_params = [{transform_indices = @transform_0, window_bounds = array<i64: 8, 128>}, {transform_indices = @transform_1, window_bounds = array<i64: 8, 128>}, {transform_indices = @transform_2, window_bounds = array<i64: 8, 128>}]} {
    %c0_i32 = arith.constant 0 : i32
    %0 = arith.cmpi eq, %arg1, %c0_i32 : i32
    %1 = arith.extui %0 : i1 to i32
    %c0_i32_0 = arith.constant 0 : i32
    %2 = arith.cmpi ne, %1, %c0_i32_0 : i32
    scf.if %2 {
      %cst_19 = arith.constant 0.000000e+00 : f32
      %48 = vector.broadcast %cst_19 : f32 to vector<8x128xf32>
      %c0_20 = arith.constant 0 : index
      %c0_21 = arith.constant 0 : index
      %49 = vector.load %arg4[%c0_20, %c0_21] : memref<8x128xf32, #tpu.memory_space<vmem>>, vector<8x128xf32>
      tpu.vector_store %arg4[%c0_20, %c0_21], %48 {strides = array<i32>} : memref<8x128xf32, #tpu.memory_space<vmem>>, vector<8x128xf32>,
    } else {
    }
    %c0 = arith.constant 0 : index
    %c0_1 = arith.constant 0 : index
    %3 = vector.load %arg2[%c0, %c0_1] : memref<8x128xf32, #tpu.memory_space<vmem>>, vector<8x128xf32>
    %c0_2 = arith.constant 0 : index
    %c0_3 = arith.constant 0 : index
    %4 = vector.load %arg3[%c0_2, %c0_3] : memref<8x128xf32, #tpu.memory_space<vmem>>, vector<8x128xf32>
    %5 = math.absf %3 : vector<8x128xf32>
    %cst = arith.constant 0.000000e+00 : f32
    %6 = vector.broadcast %cst : f32 to vector<8x128xf32>
    %7 = arith.subf %6, %5 : vector<8x128xf32>
    %8 = math.exp %7 : vector<8x128xf32>
    %cst_4 = arith.constant 0.000000e+00 : f32
    %9 = vector.broadcast %cst_4 : f32 to vector<8x128xf32>
    %10 = arith.maximumf %3, %9 : vector<8x128xf32>
    %11 = arith.mulf %3, %4 : vector<8x128xf32>
    %12 = arith.subf %10, %11 : vector<8x128xf32>
    %13 = math.log1p %8 : vector<8x128xf32>
    %14 = arith.addf %12, %13 : vector<8x128xf32>
    %cst_5 = arith.constant 1.000000e+00 : f32
    %15 = vector.broadcast %cst_5 : f32 to vector<8x128xf32>
    %16 = arith.addf %15, %8 : vector<8x128xf32>
    %cst_6 = arith.constant 1.000000e+00 : f32
    %17 = vector.broadcast %cst_6 : f32 to vector<8x128xf32>
    %18 = arith.divf %17, %16 : vector<8x128xf32>
    %cst_7 = arith.constant 0.000000e+00 : f32
    %19 = vector.broadcast %cst_7 : f32 to vector<8x128xf32>
    %20 = arith.cmpf oge, %3, %19 : vector<8x128xf32>
    %21 = arith.mulf %8, %18 : vector<8x128xf32>
    %22 = arith.select %20, %18, %21 : vector<8x128xi1>, vector<8x128xf32>
    %23 = arith.mulf %4, %22 : vector<8x128xf32>
    %cst_8 = arith.constant 1.000000e+00 : f32
    %24 = vector.broadcast %cst_8 : f32 to vector<8x128xf32>
    %25 = arith.subf %24, %4 : vector<8x128xf32>
    %cst_9 = arith.constant 1.000000e+00 : f32
    %26 = vector.broadcast %cst_9 : f32 to vector<8x128xf32>
    %27 = arith.subf %26, %22 : vector<8x128xf32>
    %28 = arith.mulf %25, %27 : vector<8x128xf32>
    %29 = arith.addf %23, %28 : vector<8x128xf32>
    %cst_10 = arith.constant 2.500000e-01 : f32
    %30 = vector.broadcast %cst_10 : f32 to vector<8x128xf32>
    %31 = arith.mulf %4, %30 : vector<8x128xf32>
    %cst_11 = arith.constant 1.000000e+00 : f32
    %32 = vector.broadcast %cst_11 : f32 to vector<8x128xf32>
    %33 = arith.subf %32, %4 : vector<8x128xf32>
    %cst_12 = arith.constant 7.500000e-01 : f32
    %34 = vector.broadcast %cst_12 : f32 to vector<8x128xf32>
    %35 = arith.mulf %33, %34 : vector<8x128xf32>
    %36 = arith.addf %31, %35 : vector<8x128xf32>
    %cst_13 = arith.constant 1.000000e+00 : f32
    %37 = vector.broadcast %cst_13 : f32 to vector<8x128xf32>
    %38 = arith.subf %37, %29 : vector<8x128xf32>
    %39 = math.sqrt %38 : vector<8x128xf32>
    %40 = arith.mulf %38, %39 : vector<8x128xf32>
    %41 = arith.mulf %14, %36 : vector<8x128xf32>
    %42 = arith.mulf %41, %40 : vector<8x128xf32>
    %c0_14 = arith.constant 0 : index
    %c0_15 = arith.constant 0 : index
    %43 = vector.load %arg4[%c0_14, %c0_15] : memref<8x128xf32, #tpu.memory_space<vmem>>, vector<8x128xf32>
    %44 = vector.shape_cast %42 : vector<8x128xf32> to vector<1x8x128xf32>
    %cst_16 = arith.constant dense<0.000000e+00> : vector<8x128xf32>
    %45 = vector.multi_reduction <add>, %44, %cst_16 [0] : vector<1x8x128xf32> to vector<8x128xf32>
    %46 = arith.addf %43, %45 : vector<8x128xf32>
    %c0_17 = arith.constant 0 : index
    %c0_18 = arith.constant 0 : index
    %47 = vector.load %arg4[%c0_17, %c0_18] : memref<8x128xf32, #tpu.memory_space<vmem>>, vector<8x128xf32>
    tpu.vector_store %arg4[%c0_17, %c0_18], %46 {strides = array<i32>} : memref<8x128xf32, #tpu.memory_space<vmem>>, vector<8x128xf32>,
    return
  }
  func.func @transform_0(%arg0: i32, %arg1: i32) -> (i32, i32) {
    %c1_i32 = arith.constant 1 : i32
    %0 = arith.muli %arg0, %c1_i32 : i32
    %1 = arith.addi %0, %arg1 : i32
    %c0_i32 = arith.constant 0 : i32
    %c0_i32_0 = arith.constant 0 : i32
    return %1, %c0_i32 : i32, i32
  }
  func.func @transform_1(%arg0: i32, %arg1: i32) -> (i32, i32) {
    %c1_i32 = arith.constant 1 : i32
    %0 = arith.muli %arg0, %c1_i32 : i32
    %1 = arith.addi %0, %arg1 : i32
    %c0_i32 = arith.constant 0 : i32
    %c0_i32_0 = arith.constant 0 : i32
    return %1, %c0_i32 : i32, i32
  }
  func.func @transform_2(%arg0: i32, %arg1: i32) -> (i32, i32) {
    %c0_i32 = arith.constant 0 : i32
    %c0_i32_0 = arith.constant 0 : i32
    return %arg0, %c0_i32 : i32, i32
  }
}

</mosaic_0001>

<bundles_post_ra>
// kernel: tpu_custom_call.1
= control target key start
LH: loop header
LB: loop body
LE: loop exit
PB: predicated region body
PF: predicated region fallthrough
CT: control target
= control target key end

     0   :  { %7 = vsyncpa [#allocation3], 0  ;;  %s869_s0 = inlined_call_operand.hbm [shape: f32[16,128], index: 0, kind: input, shape index: {}]   ;;  %s870_s1 = inlined_call_operand.hbm [shape: f32[16,128], index: 1, kind: input, shape index: {}]   ;;  %s871_s2 = inlined_call_operand.hbm [shape: f32[16,128], index: 2, kind: output, shape index: {}]  }
   0x1   :  { %9 = vsyncpa [#allocation3 + $0x1], 0 }
   0x2   :  { %10 = vsyncpa [#allocation6], 0 }
   0x3   :  { %12 = vsyncpa [#allocation6 + $0x1], 0 }
   0x4   :  { %13 = vsyncpa [#allocation4], 0 }
   0x5   :  { %15 = vsyncpa [#allocation4 + $0x1], 0  ;;  %s644_s9 = smov 0   ;;  %s646_s10 = smov 0  }
   0x6   :  { %s648_s11 = smov 0   ;;  %s650_s12 = smov 0  }
   0x7   :  { %s652_s13 = smov 0   ;;  %s654_s14 = smov 0  }
   0x8 LB: > { %s386_s15 = sadd.s32 4294967295, %s624_s14   ;;  %s387_s16 = sadd.s32 4294967294, %s624_s14   ;;  %s624_s14 = sphi %s654_s14, %s21_s14   ;;  %s620_s13 = sphi %s652_s13, %s891_s13   ;;  %s616_s12 = sphi %s650_s12, %s890_s12   ;;  %s612_s11 = sphi %s648_s11, %s889_s11   ;;  %s608_s10 = sphi %s646_s10, %s888_s10   ;;  %s604_s9 = sphi %s644_s9, %s887_s9  }
   0x9   : > { %s33_s17 = sadd.s32 1, %s620_s13  ;;  %s42_s18 = sadd.s32 1, %s612_s11 }
   0xa   : > { %p35_p0 = scmp.ge.s32.totalorder %s33_s17, 2  ;;  %p49_p1 = scmp.ne.s32.totalorder %s612_s11, %s608_s10 }
   0xb   : > { %p50_p2 = scmp.eq.s32.totalorder %s624_s14, 0  ;;  %p55_p3 = scmp.ne.s32.totalorder %s608_s10, %s604_s9 }
   0xc   : > { %s893_s17 = smov (%p35_p0, %s33_s17), 0  ;;  %p56_p5 = scmp.eq.s32.totalorder %s386_s15, 0 }
   0xd   : > { %p685_p4 = por %p50_p2, %p49_p1  ;;  %s39_s20 = ssub.s32 %s620_s13, %s893_s17 }
   0xe   : > { %p107_p6 = scmp.eq.s32.totalorder %s386_s15, 1  ;;  %p40_p7 = scmp.eq.s32.totalorder %s39_s20, 0 }
   0xf   : > { %p691_p8 = por %p56_p5, %p55_p3  ;;  %p113_p10 = scmp.eq.s32.totalorder %s387_s16, 1 }
  0x10   : > { %p695_p9 = por %p107_p6, %p49_p1  ;;  %p419_p13 = scmp.lt.s32.totalorder %s624_s14, 2 }
  0x11   : > { %s875_s21 = scalar_select %p691_p8, 1, 0 }
  0x12   : > { %s876_s22 = scalar_select %p695_p9, 1, 0 }
  0x13   : > { %s700_s23 = scalar_select %p40_p7, %s612_s11, %s42_s18  }
  0x14   : > { %p702_p11 = por %p113_p10, %p55_p3  ;;  %s709_s25 = sand.u32 1, %s612_s11  }
  0x15   : > { %s390_s26 = sshll.u32 %s709_s25, 3  ;;  %s391_s27 = sshll.u32 %s620_s13, 7 }
  0x16   : > { %s877_s24 = scalar_select %p702_p11, 1, 0 }
  0x17   : > { %s718_s30 = scalar_lea.hbm %s869_s0, %s391_s27  ;;  %s137_s3 = scalar_lea.vmem [#allocation2], %s390_s26 }
  0x18   : > { %s145_s4 = sshll.u32 %s137_s3, 4  ;;  %p726_p0 = pnand %p419_p13, %p685_p4  ;;  %s722_s4 = int_to_ptr.vmem [resolvable:$true] %s145_s4 }
  0x19   : > { %s134_s6 = scalar_lea.sflag [#allocation3], %s709_s25  ;;  %s478_s7 = scalar_lea.hbm %s718_s30, 128 }
  0x1a   : > { %p479_p3 = scmp.ne.s32.totalorder %s718_s30, %s478_s7  ;;  %p480_p5 = pneg %p726_p0 }
  0x1b   : > { %s483_s16 = scalar_lea.hbm %s869_s0, 256  ;;  %p484_p4 = scmp.lt.u32.totalorder %s718_s30, %s869_s0 }
  0x1c   : > { %p481_p6 = pnand %p480_p5, %p479_p3  ;;  %p485_p10 = scmp.lt.u32.totalorder %s483_s16, %s478_s7 }
  0x1d   : > { %p487_p12 = scmp.lt.u32.totalorder %s478_s7, %s718_s30 }
  0x1e   : > { %p482_p7 = pneg %p481_p6  ;;  %p486_p13 = por %p485_p10, %p484_p4 }
  0x20   : > { %p488_p1 = por %p487_p12, %p486_p13 }
  0x22   : > { %p489_p2 = pnand %p488_p1, %p482_p7 }
  0x24   : > { %492 = shalt.err (!%p489_p2)
}
  0x25   : > { %s493_s20 = scalar_lea.vmem %s722_s4, 128  ;;  %s626_s28 = smov [#allocation2]  }
  0x26   : > { %p494_p3 = scmp.ne.s32.totalorder %s722_s4, %s493_s20  ;;  %s498_s29 = sshll.u32 %s626_s28, 4  ;;  %s499_s29 = int_to_ptr.vmem [resolvable:$false] %s498_s29 }
  0x27   : > { %s500_s3 = scalar_lea.vmem %s499_s29, 256  ;;  %p501_p9 = scmp.lt.s32.totalorder %s722_s4, %s499_s29 }
  0x28   : > { %p496_p6 = pnand %p494_p3, %p480_p5  ;;  %p502_p4 = scmp.lt.s32.totalorder %s500_s3, %s493_s20 }
  0x2a   : > { %p497_p11 = pneg %p496_p6  ;;  %p503_p10 = por %p502_p4, %p501_p9 }
  0x2c   : > { %p504_p12 = pnand %p503_p10, %p497_p11 }
  0x2e   : > { %507 = shalt.err (!%p504_p12)
}
  0x2f   : > { %411 = dma.hbm_to_vmem [thread:$0]  (!%p726_p0), %s718_s30, 128, %s722_s4, %s134_s6  }
  0x30   : > { %p879_p1 = scmp.lt.s32.totalorder %s624_s14, 3  ;;  %p880_p2 = scmp.ge.s32.totalorder %s624_s14, 1 }
  0x31   : > { %s771_s16 = scalar_lea.hbm %s870_s1, %s391_s27  ;;  %s156_s18 = scalar_lea.vmem [#allocation5], %s390_s26 }
  0x32   : > { %p762_p7 = pnand %p880_p2, %p879_p1  ;;  %s164_s19 = sshll.u32 %s156_s18, 4  ;;  %s165_s19 = int_to_ptr.vmem [resolvable:$true] %s164_s19 }
  0x33   : > { %s153_s30 = scalar_lea.sflag [#allocation6], %s709_s25  ;;  %s508_s4 = scalar_lea.hbm %s771_s16, 128 }
  0x34   : > { %s881_s7 = scalar_select %p762_p7, 1, 0 }
  0x35   : > { %p509_p9 = scmp.ne.s32.totalorder %s771_s16, %s508_s4  ;;  %s513_s27 = scalar_lea.hbm %s870_s1, 256 }
  0x36   : > { %p514_p3 = scmp.lt.u32.totalorder %s771_s16, %s870_s1  ;;  %p515_p6 = scmp.lt.u32.totalorder %s513_s27, %s508_s4 }
  0x37   : > { %p511_p11 = pnand %p509_p9, %p480_p5  ;;  %p517_p10 = scmp.lt.u32.totalorder %s508_s4, %s771_s16 }
  0x38   : > { %p516_p4 = por %p515_p6, %p514_p3 }
  0x39   : > { %p512_p13 = pneg %p511_p11 }
  0x3a   : > { %p518_p12 = por %p517_p10, %p516_p4 }
  0x3c   : > { %p519_p1 = pnand %p518_p12, %p512_p13 }
  0x3e   : > { %522 = shalt.err (!%p519_p1)
}
  0x3f   : > { %s523_s25 = scalar_lea.vmem %s165_s19, 128  ;;  %s627_s26 = smov [#allocation5]  }
  0x40   : > { %p524_p2 = scmp.ne.s32.totalorder %s165_s19, %s523_s25  ;;  %s528_s3 = sshll.u32 %s627_s26, 4  ;;  %s529_s3 = int_to_ptr.vmem [resolvable:$false] %s528_s3 }
  0x41   : > { %s530_s8 = scalar_lea.vmem %s529_s3, 256  ;;  %p531_p8 = scmp.lt.s32.totalorder %s165_s19, %s529_s3 }
  0x42   : > { %p526_p9 = pnand %p524_p2, %p480_p5  ;;  %p532_p7 = scmp.lt.s32.totalorder %s530_s8, %s523_s25 }
  0x44   : > { %p527_p11 = pneg %p526_p9  ;;  %p533_p3 = por %p532_p7, %p531_p8 }
  0x46   : > { %p534_p6 = pnand %p533_p3, %p527_p11 }
  0x48   : > { %537 = shalt.err (!%p534_p6)
}
  0x49   : > { %414 = dma.hbm_to_vmem [thread:$0]  (!%p726_p0), %s771_s16, 128, %s165_s19, %s153_s30  }
  0x4a   : > { %p882_p13 = scmp.ne.s32.totalorder %s881_s7, 0 }
  0x4b   : > { %s798_s15 = sand.u32 (!%p882_p13), 1, %s608_s10   ;;  %p883_p8 = scmp.ne.s32.totalorder (!%p882_p13), %s875_s21, 0 }
  0x4c   : > { %173 = sbr.rel (%p882_p13) target bundleno = 161 (0xa1), region = 28  ;;  %s801_s18 = sshll.u32 (!%p882_p13), %s798_s15, 3 }
  0x4d   : > { %s176_s4 = scalar_lea.sflag (!%p882_p13), [#allocation3], %s798_s15  ;;  %s179_s6 = scalar_lea.vmem (!%p882_p13), [#allocation2], %s801_s18 }
  0x53   : > { %591 = dma.done.wait (%p883_p8), %s176_s4, 128  }
  0x54   : > { %593 = vsyncadd (%p883_p8), %s176_s4, 4294967168  ;;  %s185_s5 = scalar_lea.sflag [#allocation6], %s798_s15  ;;  %s188_s7 = scalar_lea.vmem [#allocation5], %s801_s18 }
  0x55   : > { %595 = dma.done.wait (%p883_p8), %s185_s5, 128  }
  0x56   : > { %597 = vsyncadd (%p883_p8), %s185_s5, 4294967168  ;;  %v221_v0 = vld [vmem:[%s179_s6] sm:$0xff]  ;;  %v222_v6 = vld [vmem:[%s188_s7] sm:$0xff]  ;;  %s399_s21 = sshll.u32 %s616_s12, 7  ;;  %s213_s16 = scalar_lea.vmem [#allocation7], %s801_s18 }
  0x57   : > { %v223_v1 = vand.u32 2147483647, %v221_v0  ;;  %vm243_vm0 = vcmp.ge.f32.partialorder %v221_v0, 0.0  ;;  %v247_v9 = vsub.f32 1.0, %v222_v6  ;;  %v227_v20 = vmax.f32 %v221_v0, 0.0  ;;  %s283_s19 = sshll.u32 %s213_s16, 4  ;;  %s820_s27 = scalar_lea.hbm %s871_s2, %s399_s21  ;;  %s822_s19 = int_to_ptr.vmem [resolvable:$true] %s283_s19 }
  0x58   : > { %v228_v21 = vmul.f32 %v222_v6, %v221_v0  ;;  %v251_v25 = vmul.f32 0.25, %v222_v6  ;;  %s270_s28 = scalar_lea.sflag [#allocation4], %s798_s15  ;;  %s538_s29 = scalar_lea.vmem %s822_s19, 128 }
  0x59   : > { %v224_v2 = vsub.f32 0.0, %v223_v1  ;;  %v252_v26 = vmul.f32 0.75, %v247_v9  ;;  %p539_p0 = scmp.ne.s32.totalorder %s822_s19, %s538_s29  ;;  %p884_p5 = scmp.ne.s32.totalorder %s876_s22, 0 }
  0x5a   : > { %v229_v24 = vsub.f32 %v227_v20, %v228_v21  ;;  %s628_s12 = smov [#allocation7]  }
  0x5b   : > { %v225_v3 = vmul.f32 1.442695, %v224_v2  ;;  %v253_v29 = vadd.f32 %v252_v26, %v251_v25  ;;  %p540_p7 = pnand %p539_p0, %p884_p5  ;;  %s542_s25 = sshll.u32 %s628_s12, 4  ;;  %s543_s25 = int_to_ptr.vmem [resolvable:$false] %s542_s25 }
  0x5c   : > { %s544_s26 = scalar_lea.vmem %s543_s25, 256  ;;  %p545_p10 = scmp.lt.s32.totalorder %s822_s19, %s543_s25 }
  0x5d   : > { %470 = vpow2.f32 %v225_v3  ;;  %p541_p4 = pneg %p540_p7  ;;  %p546_p12 = scmp.lt.s32.totalorder %s544_s26, %s538_s29 }
  0x5f   : > { %p547_p1 = por %p546_p12, %p545_p10 }
  0x61   : > { %p548_p2 = pnand %p547_p1, %p541_p4 }
  0x67   : > { %v471_v4 = vpop.eup %470 }
  0x68   : > { %v230_v5 = vadd.f32 1.0, %v471_v4  ;;  %v233_v13 = vmul.f32 -0.5, %v471_v4  ;;  %v236_v19 = vand.u32 2147483647, %v471_v4 }
  0x6a   : > { %472 = vrcp.f32 %v230_v5  ;;  %v234_v16 = vadd.f32 1.0, %v233_v13  ;;  %vm237_vm1 = vcmp.lt.f32.partialorder %v236_v19, 0.0004427343 }
  0x6b   : > { %474 = vlog2.f32 %v230_v5 }
  0x6c   : > { %v235_v23 = vmul.f32 %v471_v4, %v234_v16 }
  0x74   : > { %v473_v7 = vpop.eup %472 }
  0x75   : > { %v244_v8 = vmul.f32 %v473_v7, %v471_v4  ;;  %v475_v18 = vpop.eup %474 }
  0x76   : > { %v232_v22 = vmul.f32 0.6931472, %v475_v18 }
  0x77   : > { %v245_v10 = vsel %vm243_vm0, %v473_v7, %v244_v8 }
  0x78   : > { %v246_v11 = vmul.f32 %v245_v10, %v222_v6  ;;  %v248_v12 = vsub.f32 1.0, %v245_v10  ;;  %v238_v27 = vsel %vm237_vm1, %v235_v23, %v232_v22 }
  0x79   : > { %v239_v28 = vadd.f32 %v238_v27, %v229_v24 }
  0x7a   : > { %v249_v14 = vmul.f32 %v248_v12, %v247_v9 }
  0x7b   : > { %v263_v34 = vmul.f32 %v253_v29, %v239_v28 }
  0x7c   : > { %v250_v15 = vadd.f32 %v249_v14, %v246_v11 }
  0x7e   : > { %v254_v17 = vsub.f32 1.0, %v250_v15 }
  0x80   : > { %476 = vrsqrt.f32 %v254_v17  ;;  %vm257_vm2 = vcmp.eq.f32.partialorder %v254_v17, inf  ;;  %v260_v31 = vand.u32 2147483648, %v254_v17  ;;  %vm259_vm3 = vcmp.eq.f32.partialorder %v254_v17, 0.0 }
  0x8a   : > { %v477_v30 = vpop.eup %476 }
  0x8b   : > { %v256_v32 = vmul.f32 %v477_v30, %v254_v17 }
  0x8d   : > { %v258_v33 = vsel %vm257_vm2, %v254_v17, %v256_v32 }
  0x8e   : > { %v261_v35 = vsel %vm259_vm3, %v260_v31, %v258_v33 }
  0x8f   : > { %v262_v36 = vmul.f32 %v261_v35, %v254_v17 }
  0x91   : > { %v264_v37 = vmul.f32 %v263_v34, %v262_v36 }
  0x93   : > { %268 = vst [vmem:[%s213_s16] sm:$0xff] %v264_v37 }
  0x94   : > { %551 = shalt.err (!%p548_p2)
}
  0x95   : > { %s552_s3 = scalar_lea.hbm %s820_s27, 128  ;;  %s556_s18 = scalar_lea.hbm %s871_s2, 256 }
  0x96   : > { %p553_p9 = scmp.ne.s32.totalorder %s820_s27, %s552_s3  ;;  %p557_p6 = scmp.lt.u32.totalorder %s820_s27, %s871_s2 }
  0x97   : > { %p558_p13 = scmp.lt.u32.totalorder %s556_s18, %s552_s3  ;;  %p560_p0 = scmp.lt.u32.totalorder %s552_s3, %s820_s27 }
  0x98   : > { %p554_p11 = pnand %p553_p9, %p884_p5 }
  0x99   : > { %p559_p8 = por %p558_p13, %p557_p6 }
  0x9a   : > { %p555_p3 = pneg %p554_p11 }
  0x9b   : > { %p561_p7 = por %p560_p0, %p559_p8 }
  0x9d   : > { %p562_p4 = pnand %p561_p7, %p555_p3 }
  0x9f   : > { %565 = shalt.err (!%p562_p4)
}
  0xa0   : > { %406 = dma.vmem_to_hbm [thread:$0]  (%p884_p5), %s822_s19, 128, %s820_s27, %s270_s28  }
  0xa1 PF: > { %s295_s5 = sand.u32 1, %s604_s9   ;;  %p885_p10 = scmp.ne.s32.totalorder %s877_s24, 0 }
  0xa2   : > { %p886_p12 = scmp.ge.s32.totalorder %s624_s14, 2  ;;  %s296_s7 = scalar_lea.sflag [#allocation4], %s295_s5 }
  0xa4   : > { %p416_p1 = pnand %p886_p12, %p885_p10 }
  0xa6   : > { %599 = dma.done.wait (!%p416_p1), %s296_s7, 128  }
  0xa7   : > { %601 = vsyncadd (!%p416_p1), %s296_s7, 4294967168  ;;  %s21_s14 = sadd.s32 1, %s624_s14   ;;  %s887_s9 = smov %s608_s10 }
  0xa8   : > { %p18_p2 = scmp.ge.s32.totalorder %s21_s14, 4   ;;  %s888_s10 = smov %s612_s11 }
  0xa9   : > { %s889_s11 = smov %s700_s23  ;;  %s890_s12 = smov %s620_s13 }
  0xaa   : > { %s891_s13 = smov %s893_s17  ;;  %20 = sbr.rel (!%p18_p2) target bundleno = 8 (0x8), region = 90 }
  0xb1   :  { %301 = vsyncpa [#allocation3], 1 }
  0xb2   :  { %303 = vsyncpa [#allocation3 + $0x1], 1 }
  0xb3   :  { %304 = vsyncpa [#allocation6], 1 }
  0xb4   :  { %306 = vsyncpa [#allocation6 + $0x1], 1 }
  0xb5   :  { %307 = vsyncpa [#allocation4], 1 }
  0xb6   :  { %309 = vsyncpa [#allocation4 + $0x1], 1 }

</bundles_post_ra>
